<compile_context>
chip_gen: v7x
topology: tpu7x:2x2x1
jax: 0.10.0
libtpu: 0.0.40
codegen_flags: <defaults>
</compile_context>

<pallas_src>
import jax
import jax.numpy as jnp
import numpy as np
from jax.experimental import pallas as pl
from jax.experimental.pallas import tpu as pltpu

_LANES = 128


def ltu_kernel(p_ref, x_ref, o_ref):
    # p_ref: SMEM f32[5] = [w0, w1, b, u0, u1] — scalar reads -> vreg splats.
    w0 = p_ref[0]
    w1 = p_ref[1]
    b = p_ref[2]
    u0 = p_ref[3]
    u1 = p_ref[4]

    v = x_ref[...].astype(jnp.float32)                 # (bm, 128), interleaved
    lane = jax.lax.broadcasted_iota(jnp.int32, v.shape, 1)
    is_even = (lane % 2) == 0                          # even lane = feature 0

    # Per-lane weighted value: x0*w0 on even lanes, x1*w1 on odd lanes.
    s = v * jnp.where(is_even, w0, w1)

    # Partner-lane value within each (2k, 2k+1) pair.  128 is even, so pairs
    # never straddle a row of lanes and the rotation wrap-around is harmless.
    #   roll(s, 127)[j] = s[(j+1) % 128]  -> partner for even lanes
    #   roll(s,   1)[j] = s[(j-1) % 128]  -> partner for odd lanes
    partner = jnp.where(is_even,
                        pltpu.roll(s, 127, 1),
                        pltpu.roll(s, 1, 1))

    # z = tanh(x @ w.T + b), replicated on both lanes of the pair (EUP).
    z = jnp.tanh(s + partner + b)

    # out = z @ u + x  (outer product with u, plus residual).
    out = v + z * jnp.where(is_even, u0, u1)
    o_ref[...] = out.astype(o_ref.dtype)


def ltu_forward(x, w, b, u, *, max_block_rows=8192, min_grid_steps=2):
    """x: (N, 2); w: (1, 2); b: (1,); u: (1, 2).  Returns (N, 2) in x.dtype."""
    N, D = x.shape
    assert D == 2, "LTU operates on 2-D latent vectors"
    dtype = x.dtype
    itemsize = jnp.dtype(dtype).itemsize
    # Second-minor tile multiple depends on dtype packing (f32:8, bf16:16).
    sub = {4: 8, 2: 16, 1: 32}.get(itemsize, 8)

    # Pack parameters into one small SMEM vector: [w0, w1, b, u0, u1].
    params = jnp.concatenate(
        [jnp.asarray(w).reshape(-1),
         jnp.asarray(b).reshape(-1),
         jnp.asarray(u).reshape(-1)]).astype(jnp.float32)

    # Lane-dense interleaved layout: (N, 2) row-major -> (2N,) -> (R, 128).
    total = 2 * N
    rows = pl.cdiv(total, _LANES)
    r_pad = pl.cdiv(rows, sub) * sub                   # pad to one vreg slab only
    pad = r_pad * _LANES - total

    x_flat = x.reshape(-1)                             # row-major flatten: free
    if pad:
        x_flat = jnp.pad(x_flat, (0, pad))
    x_tiles = x_flat.reshape(r_pad, _LANES)

    # Block rows: multiple of `sub`, <= max_block_rows, and small enough that
    # the grid has >= min_grid_steps steps (v7x megacore) when data > 1 slab.
    max_block_rows = max(sub, (int(max_block_rows) // sub) * sub)
    target = pl.cdiv(pl.cdiv(r_pad, max(1, int(min_grid_steps))), sub) * sub
    bm = max(sub, min(max_block_rows, target))
    grid = (pl.cdiv(r_pad, bm),)                       # last block may be ragged

    out_tiles = pl.pallas_call(
        ltu_kernel,
        out_shape=jax.ShapeDtypeStruct((r_pad, _LANES), dtype),
        grid_spec=pltpu.PrefetchScalarGridSpec(
            num_scalar_prefetch=0,
            grid=grid,
            in_specs=[
                pl.BlockSpec(memory_space=pltpu.MemorySpace.SMEM),   # params
                pl.BlockSpec((bm, _LANES), lambda i: (i, 0)),        # x tiles
            ],
            out_specs=pl.BlockSpec((bm, _LANES), lambda i: (i, 0)),
        ),
        compiler_params=pltpu.CompilerParams(
            dimension_semantics=("parallel",),
            vmem_limit_bytes=32 * 1024 * 1024,
        ),
        cost_estimate=pl.CostEstimate(
            flops=12 * N,
            transcendentals=2 * N,
            bytes_accessed=2 * total * itemsize),
    )(params, x_tiles)

    out_flat = out_tiles.reshape(-1)
    if pad:
        out_flat = out_flat[:total]
    return out_flat.reshape(N, 2)


def init_ltu_params(key):
    """Deterministic init matching nn.Parameter(torch.randn(...).normal_(0, 0.1))."""
    kw, kb, ku = jax.random.split(key, 3)
    w = 0.1 * jax.random.normal(kw, (1, 2), dtype=jnp.float32)
    b = 0.1 * jax.random.normal(kb, (1,), dtype=jnp.float32)
    u = 0.1 * jax.random.normal(ku, (1, 2), dtype=jnp.float32)

    # get_u_hat(): enforce w^T u >= -1 (invertibility), applied only if
    # (u @ w.T < -1).any(), exactly as in the PyTorch __init__.
    wtu = float(np.dot(np.asarray(u), np.asarray(w).T)[0, 0])
    if wtu < -1.0:
        m_wtu = -1.0 + np.log1p(np.exp(wtu))
        norm_sq = float(np.sum(np.asarray(w) ** 2, axis=1)[0])
        u = u + (m_wtu - wtu) * w / norm_sq
    return w, b, u


def ltu_reference(x, w, b, u):
    z = x @ w.T
    z = z + b
    z = jnp.tanh(z)
    z = z @ u
    return z + x


if __name__ == "__main__":
    key = jax.random.PRNGKey(0)
    k_param, k_x1, k_x2, k_x3 = jax.random.split(key, 4)

    w, b, u = init_ltu_params(k_param)

    # Small batch of 2-D latents (the module's intended use): single block.
    x_small = jax.random.normal(k_x1, (16, 2), dtype=jnp.float32)
    out_small = jax.block_until_ready(ltu_forward(x_small, w, b, u))
    np.testing.assert_allclose(
        np.asarray(out_small), np.asarray(ltu_reference(x_small, w, b, u)),
        rtol=1e-5, atol=1e-5)

    # Non-multiple-of-128 batch, default block sizing: >=2 grid steps (v7x path).
    x_big = jax.random.normal(k_x2, (3000, 2), dtype=jnp.float32)
    out_big = jax.block_until_ready(ltu_forward(x_big, w, b, u))
    ref_big = np.asarray(ltu_reference(x_big, w, b, u))
    np.testing.assert_allclose(np.asarray(out_big), ref_big, rtol=1e-5, atol=1e-5)

    # Same batch, forced small blocks -> multi-step grid with a ragged last
    # block (exercises the masked-edge write path).
    out_big2 = jax.block_until_ready(
        ltu_forward(x_big, w, b, u, max_block_rows=32, min_grid_steps=1))
    np.testing.assert_allclose(np.asarray(out_big2), ref_big, rtol=1e-5, atol=1e-5)

    # Native bf16 I/O path (half the HBM bytes); compute stays f32 in-kernel.
    x_bf16 = jax.random.normal(k_x3, (1000, 2), dtype=jnp.float32).astype(jnp.bfloat16)
    out_bf16 = jax.block_until_ready(ltu_forward(x_bf16, w, b, u))
    ref_bf16 = np.asarray(ltu_reference(x_bf16.astype(jnp.float32), w, b, u))
    np.testing.assert_allclose(
        np.asarray(out_bf16.astype(jnp.float32)), ref_bf16, rtol=2e-2, atol=2e-2)

    print("KERNEL_OK")
</pallas_src>

<mosaic_0001>
module attributes {stable_mosaic.version = 11 : i64} {
  func.func @ltu_kernel(%arg0: i32, %arg1: memref<5xf32, #tpu.memory_space<smem>>, %arg2: memref<8x128xf32, #tpu.memory_space<vmem>>, %arg3: memref<8x128xf32, #tpu.memory_space<vmem>>) attributes {dimension_semantics = [#tpu.dimension_semantics<parallel>], iteration_bounds = array<i64: 1>, scalar_prefetch = 0 : i64, scratch_operands = 0 : i64, tpu.core_type = #tpu.core_type<tc>, window_params = [{transform_indices = @transform_0, window_bounds = array<i64: 5>}, {transform_indices = @transform_1, window_bounds = array<i64: 8, 128>}, {transform_indices = @transform_2, window_bounds = array<i64: 8, 128>}]} {
    %c0 = arith.constant 0 : index
    %0 = memref.load %arg1[%c0] : memref<5xf32, #tpu.memory_space<smem>>
    %c1 = arith.constant 1 : index
    %1 = memref.load %arg1[%c1] : memref<5xf32, #tpu.memory_space<smem>>
    %c2 = arith.constant 2 : index
    %2 = memref.load %arg1[%c2] : memref<5xf32, #tpu.memory_space<smem>>
    %c3 = arith.constant 3 : index
    %3 = memref.load %arg1[%c3] : memref<5xf32, #tpu.memory_space<smem>>
    %c4 = arith.constant 4 : index
    %4 = memref.load %arg1[%c4] : memref<5xf32, #tpu.memory_space<smem>>
    %c0_0 = arith.constant 0 : index
    %c0_1 = arith.constant 0 : index
    %5 = vector.load %arg2[%c0_0, %c0_1] : memref<8x128xf32, #tpu.memory_space<vmem>>, vector<8x128xf32>
    %6 = tpu.iota {dimensions = array<i32: 1>} : vector<8x128xi32>
    %c2_i32 = arith.constant 2 : i32
    %c0_i32 = arith.constant 0 : i32
    %7 = arith.cmpi eq, %c2_i32, %c0_i32 : i32
    %c1_i32 = arith.constant 1 : i32
    %8 = arith.select %7, %c1_i32, %c2_i32 : i32
    %9 = vector.broadcast %8 : i32 to vector<8x128xi32>
    %10 = arith.remsi %6, %9 : vector<8x128xi32>
    %c0_i32_2 = arith.constant 0 : i32
    %11 = vector.broadcast %c0_i32_2 : i32 to vector<8x128xi32>
    %12 = arith.cmpi ne, %10, %11 : vector<8x128xi32>
    %c0_i32_3 = arith.constant 0 : i32
    %13 = vector.broadcast %c0_i32_3 : i32 to vector<8x128xi32>
    %14 = arith.cmpi slt, %10, %13 : vector<8x128xi32>
    %c0_i32_4 = arith.constant 0 : i32
    %15 = arith.cmpi slt, %8, %c0_i32_4 : i32
    %16 = vector.broadcast %15 : i1 to vector<8x128xi1>
    %17 = vector.broadcast %16 : vector<8x128xi1> to vector<8x128xi1>
    %18 = arith.xori %14, %17 : vector<8x128xi1>
    %19 = arith.andi %18, %12 : vector<8x128xi1>
    %20 = vector.broadcast %8 : i32 to vector<8x128xi32>
    %21 = arith.addi %10, %20 : vector<8x128xi32>
    %22 = arith.select %19, %21, %10 : vector<8x128xi1>, vector<8x128xi32>
    %c0_i32_5 = arith.constant 0 : i32
    %23 = vector.broadcast %c0_i32_5 : i32 to vector<8x128xi32>
    %24 = arith.cmpi eq, %22, %23 : vector<8x128xi32>
    %25 = vector.broadcast %0 : f32 to vector<8x128xf32>
    %26 = vector.broadcast %1 : f32 to vector<8x128xf32>
    %27 = arith.select %24, %25, %26 : vector<8x128xi1>, vector<8x128xf32>
    %28 = arith.mulf %5, %27 : vector<8x128xf32>
    %c127_i32 = arith.constant 127 : i32
    %29 = tpu.dynamic_rotate %28 by %c127_i32 dim 1 : vector<8x128xf32>, i32 -> vector<8x128xf32>
    %c1_i32_6 = arith.constant 1 : i32
    %30 = tpu.dynamic_rotate %28 by %c1_i32_6 dim 1 : vector<8x128xf32>, i32 -> vector<8x128xf32>
    %31 = arith.select %24, %29, %30 : vector<8x128xi1>, vector<8x128xf32>
    %32 = arith.addf %28, %31 : vector<8x128xf32>
    %33 = vector.broadcast %2 : f32 to vector<8x128xf32>
    %34 = arith.addf %32, %33 : vector<8x128xf32>
    %35 = math.tanh %34 : vector<8x128xf32>
    %36 = vector.broadcast %3 : f32 to vector<8x128xf32>
    %37 = vector.broadcast %4 : f32 to vector<8x128xf32>
    %38 = arith.select %24, %36, %37 : vector<8x128xi1>, vector<8x128xf32>
    %39 = arith.mulf %35, %38 : vector<8x128xf32>
    %40 = arith.addf %5, %39 : vector<8x128xf32>
    %c0_7 = arith.constant 0 : index
    %c0_8 = arith.constant 0 : index
    %41 = vector.load %arg3[%c0_7, %c0_8] : memref<8x128xf32, #tpu.memory_space<vmem>>, vector<8x128xf32>
    tpu.vector_store %arg3[%c0_7, %c0_8], %40 {strides = array<i32>} : memref<8x128xf32, #tpu.memory_space<vmem>>, vector<8x128xf32>,
    return
  }
  func.func @transform_0(%arg0: i32) -> i32 {
    %c0_i32 = arith.constant 0 : i32
    %c0_i32_0 = arith.constant 0 : i32
    return %c0_i32 : i32
  }
  func.func @transform_1(%arg0: i32) -> (i32, i32) {
    %c0_i32 = arith.constant 0 : i32
    %c0_i32_0 = arith.constant 0 : i32
    return %arg0, %c0_i32 : i32, i32
  }
  func.func @transform_2(%arg0: i32) -> (i32, i32) {
    %c0_i32 = arith.constant 0 : i32
    %c0_i32_0 = arith.constant 0 : i32
    return %arg0, %c0_i32 : i32, i32
  }
}

</mosaic_0001>

<bundles_post_ra>
// kernel: tpu_custom_call.1
= control target key start
LH: loop header
LB: loop body
LE: loop exit
PB: predicated region body
PF: predicated region fallthrough
CT: control target
= control target key end

     0   :  { %7 = vsyncpa [#allocation5], 0  ;;  %s228_s0 = inlined_call_operand.hbm [shape: f32[5], index: 0, kind: input, shape index: {}]   ;;  %s229_s1 = inlined_call_operand.hbm [shape: f32[8,128], index: 1, kind: input, shape index: {}]   ;;  %s230_s2 = inlined_call_operand.hbm [shape: f32[8,128], index: 2, kind: output, shape index: {}]  }
   0x1   :  { %8 = vsyncpa [#allocation3], 0 }
   0x2   :  { %9 = vsyncpa [#allocation4], 0  ;;  %s102_s11 = scalar_lea.hbm %s228_s0, 16 }
   0x3   :  { %p103_p0 = scmp.ne.s32.totalorder %s228_s0, %s102_s11  ;;  %p106_p1 = scmp.lt.u32.totalorder %s102_s11, %s228_s0 }
   0x5   :  { %p108_p2 = pnand %p106_p1, %p103_p0 }
   0x7   :  { %111 = shalt.err (!%p108_p2)
}
   0x8   :  { %s162_s16 = smov [#allocation2]   ;;  %s163_s19 = smov [#allocation6]  }
   0x9   :  { %17 = dma.hbm_to_smem %s228_s0, 16, %s162_s16, [#allocation5]  }
   0xa   :  { %s24_s20 = sshll.u32 %s163_s19, 4  ;;  %s112_s23 = scalar_lea.hbm %s229_s1, 128  ;;  %s25_s20 = int_to_ptr.vmem [resolvable:$true] %s24_s20 }
   0xb   :  { %p113_p3 = scmp.ne.s32.totalorder %s229_s1, %s112_s23  ;;  %p116_p4 = scmp.lt.u32.totalorder %s112_s23, %s229_s1 }
   0xd   :  { %p118_p5 = pnand %p116_p4, %p113_p3 }
   0xf   :  { %121 = shalt.err (!%p118_p5)
}
  0x10   :  { %s122_s28 = scalar_lea.vmem %s25_s20, 128  ;;  %p127_p7 = scmp.lt.s32.totalorder %s25_s20, %s25_s20 }
  0x11   :  { %p123_p6 = scmp.ne.s32.totalorder %s25_s20, %s122_s28  ;;  %p128_p8 = scmp.lt.s32.totalorder %s122_s28, %s122_s28 }
  0x13   :  { %p129_p9 = por %p128_p8, %p127_p7 }
  0x15   :  { %p130_p10 = pnand %p129_p9, %p123_p6 }
  0x17   :  { %133 = shalt.err (!%p130_p10)
}
  0x18   :  { %27 = dma.hbm_to_vmem [thread:$0]  %s229_s1, 128, %s25_s20, [#allocation3]  }
  0x19   :  { %156 = dma.done.wait [#allocation5], 16  }
  0x1a   :  { %157 = vsyncadd [#allocation5], 4294967280 }
  0x1b   :  { %158 = dma.done.wait [#allocation3], 128  }
  0x1c   :  { %159 = vsyncadd [#allocation3], 4294967168 }
  0x1d   :  { %34 = sfence }
  0x1e   :  { %s35_s30 = sld [smem:[#allocation2]]  ;;  %s91_s3 = sld [smem:[#allocation2 + $0x1]]  ;;  %v41_v0 = vlaneseq  ;;  %v40_v3 = vld [vmem:[#allocation6] sm:$0xff] }
  0x1f   :  { %s164_s1 = smov 127   ;;  %s165_s4 = smov 1  }
  0x20   :  { %v42_v1 = vand.u32 127, %v41_v0  ;;  %s92_s5 = sld [smem:[#allocation2 + $0x2]]  ;;  %s93_s6 = sld [smem:[#allocation2 + $0x3]] }
  0x21   :  { %s94_s7 = sld [smem:[#allocation2 + $0x4]]  ;;  %s166_s8 = smov [#allocation7]  }
  0x22   :  { %v47_v2 = vand.u32 1, %v42_v1  ;;  %s81_s9 = sshll.u32 %s166_s8, 4  ;;  %s82_s9 = int_to_ptr.vmem [resolvable:$true] %s81_s9 }
  0x23   :  { %s134_s10 = scalar_lea.vmem %s82_s9, 128  ;;  %p139_p12 = scmp.lt.s32.totalorder %s82_s9, %s82_s9 }
  0x24   :  { %vm206_vm0 = vcmp.eq.s32.totalorder %v47_v2, 0  ;;  %v56_v5 = vstv %s35_s30  ;;  %v57_v6 = vstv %s91_s3  ;;  %p135_p11 = scmp.ne.s32.totalorder %s82_s9, %s134_s10  ;;  %p140_p13 = scmp.lt.s32.totalorder %s134_s10, %s134_s10 }
  0x25   :  { %v58_v7 = vsel %vm206_vm0, %v56_v5, %v57_v6 }
  0x26   :  { %v59_v8 = vmul.f32 %v58_v7, %v40_v3  ;;  %v66_v11 = vstv %s92_s5  ;;  %v69_v15 = vstv %s93_s6  ;;  %p141_p0 = por %p140_p13, %p139_p12 }
  0x27   :  { %v70_v16 = vstv %s94_s7 }
  0x28   :  { %60 = vrot.lane.b32.xlu0 %v59_v8, %s164_s1  ;;  %v71_v17 = vsel %vm206_vm0, %v69_v15, %v70_v16  ;;  %p142_p1 = pnand %p141_p0, %p135_p11 }
  0x2c   :  { %62 = vrot.lane.b32.xlu0 %v59_v8, %s165_s4 }
  0x9a   :  { %v61_v9 = vpop.permute.xlu0 %60 }
  0x9e   :  { %v63_v10 = vpop.permute.xlu0 %62 }
  0x9f   :  { %v64_v12 = vsel %vm206_vm0, %v61_v9, %v63_v10 }
  0xa0   :  { %v65_v13 = vadd.f32 %v64_v12, %v59_v8 }
  0xa2   :  { %v67_v14 = vadd.f32 %v66_v11, %v65_v13 }
  0xa4   :  { %100 = vtanh.f32 %v67_v14 }
  0xae   :  { %v101_v18 = vpop.eup %100 }
  0xaf   :  { %v72_v19 = vmul.f32 %v101_v18, %v71_v17 }
  0xb1   :  { %v73_v20 = vadd.f32 %v72_v19, %v40_v3 }
  0xb3   :  { %74 = vst [vmem:[#allocation7] sm:$0xff] %v73_v20 }
  0xb4   :  { %145 = shalt.err (!%p142_p1)
}
  0xb5   :  { %s146_s13 = scalar_lea.hbm %s230_s2, 128 }
  0xb6   :  { %p147_p2 = scmp.ne.s32.totalorder %s230_s2, %s146_s13  ;;  %p150_p3 = scmp.lt.u32.totalorder %s146_s13, %s230_s2 }
  0xb8   :  { %p152_p4 = pnand %p150_p3, %p147_p2 }
  0xba   :  { %155 = shalt.err (!%p152_p4)
}
  0xbb   :  { %84 = dma.vmem_to_hbm [thread:$0]  %s82_s9, 128, %s230_s2, [#allocation4]  }
  0xbc   :  { %160 = dma.done.wait [#allocation4], 128  }
  0xbd   :  { %161 = vsyncadd [#allocation4], 4294967168 }
  0xbe   :  { %88 = vsyncpa [#allocation3], 1 }
  0xbf   :  { %89 = vsyncpa [#allocation4], 1 }
  0xc0   :  { %90 = vsyncpa [#allocation5], 1 }

</bundles_post_ra>
